<compile_context>
chip_gen: v7x
topology: tpu7x:2x2x1
jax: 0.10.0
libtpu: 0.0.40
codegen_flags: <defaults>
</compile_context>

<pallas_src>
import jax
import jax.numpy as jnp
from jax import lax
from jax.experimental import pallas as pl
from jax.experimental.pallas import tpu as pltpu


def _lstm_kernel(x_ref, t_ref, wx_ref, wt_ref, b_ref, wh_ref, out_ref):
    """Fully fused LSTM forward: input projection prologue + unrolled time recurrence.

    x_ref : (B, T, Fx)   raw features
    t_ref : (B, T, Ft)   time features
    wx_ref: (Fx, 4H)     W_ih[:, :Fx]^T    (PyTorch gate order i, f, g, o)
    wt_ref: (Ft, 4H)     W_ih[:, Fx:]^T
    b_ref : (1, 4H)      b_ih + b_hh
    wh_ref: (H, 4H)      W_hh^T
    out_ref: (B, H)      h_T (last hidden state)
    """
    B, T, Fx = x_ref.shape
    Ft = t_ref.shape[2]
    H = out_ref.shape[1]

    # ---- Prologue: fused input projection for all timesteps (one MXU pass each). ----
    # Row index of the 2-D view is b*T + t; reshape back to (B, T, 4H) is
    # layout-preserving (T == 8 == sublane tile).
    x2 = x_ref[...].reshape(B * T, Fx)
    t2 = t_ref[...].reshape(B * T, Ft)
    zx = (jnp.dot(x2, wx_ref[...], preferred_element_type=jnp.float32)
          + jnp.dot(t2, wt_ref[...], preferred_element_type=jnp.float32)
          + b_ref[...])                                  # (B*T, 4H)
    zx = zx.reshape(B, T, 4 * H)                         # (B, T, 4H)

    wh = wh_ref[...]                                     # (H, 4H), loop-invariant

    def gates(z, c):
        # Full-vreg nonlinearities (one EUP push each over all 4H lanes), slice after.
        sig = 0.5 * jnp.tanh(0.5 * z) + 0.5              # sigmoid, stays on EUP
        tnh = jnp.tanh(z)
        i = sig[:, 0 * H:1 * H]
        f = sig[:, 1 * H:2 * H]
        g = tnh[:, 2 * H:3 * H]
        o = sig[:, 3 * H:4 * H]
        c_new = f * c + i * g
        h_new = o * jnp.tanh(c_new)
        return h_new, c_new

    # ---- Peeled t = 0: h0 = c0 = 0, so no recurrent matmul is needed. ----
    h, c = gates(zx[:, 0, :], jnp.zeros((B, H), jnp.float32))

    # ---- Remaining steps: static loop (T small), one small MXU matmul per step. ----
    for t in range(1, T):
        z = zx[:, t, :] + jnp.dot(h, wh, preferred_element_type=jnp.float32)
        h, c = gates(z, c)

    out_ref[...] = h.astype(out_ref.dtype)


def rnn_forward(x, time, params):
    """x: (B, T, F_x), time: (B, T, F_t) -> (B, H) (squeezed like torch)."""
    w_ih, w_hh, b_ih, b_hh = params            # torch shapes: (4H,D),(4H,H),(4H,),(4H,)
    B, T, Fx = x.shape
    Ft = time.shape[-1]
    H = w_hh.shape[1]

    # Parameter re-layouts (done once per call; constant-foldable / hoistable in a
    # real model where params are static across calls).
    wx = jnp.transpose(w_ih[:, :Fx]).astype(jnp.float32)       # (Fx, 4H)
    wt = jnp.transpose(w_ih[:, Fx:]).astype(jnp.float32)       # (Ft, 4H)
    b = (b_ih + b_hh).astype(jnp.float32).reshape(1, 4 * H)    # (1, 4H)
    wh = jnp.transpose(w_hh).astype(jnp.float32)               # (H, 4H)

    out = pl.pallas_call(
        _lstm_kernel,
        out_shape=jax.ShapeDtypeStruct((B, H), jnp.float32),
        in_specs=[pl.BlockSpec(memory_space=pltpu.MemorySpace.VMEM)] * 6,
        out_specs=pl.BlockSpec(memory_space=pltpu.MemorySpace.VMEM),
    )(x.astype(jnp.float32), time.astype(jnp.float32), wx, wt, b, wh)

    return jnp.squeeze(out)   # matches torch.squeeze(out[:, -1, :])


rnn_forward_jit = jax.jit(rnn_forward)


def _reference_lstm(x, time, params):
    """Pure-JAX reference (lax.scan) for validation."""
    w_ih, w_hh, b_ih, b_hh = params
    xt = jnp.concatenate([x, time], axis=-1).astype(jnp.float32)
    B, T, D = xt.shape
    H = w_hh.shape[1]

    def step(carry, x_t):
        h, c = carry
        z = x_t @ w_ih.T + h @ w_hh.T + b_ih + b_hh
        i = jax.nn.sigmoid(z[:, 0 * H:1 * H])
        f = jax.nn.sigmoid(z[:, 1 * H:2 * H])
        g = jnp.tanh(z[:, 2 * H:3 * H])
        o = jax.nn.sigmoid(z[:, 3 * H:4 * H])
        c = f * c + i * g
        h = o * jnp.tanh(c)
        return (h, c), h

    h0 = jnp.zeros((B, H), jnp.float32)
    (_, _), hs = jax.lax.scan(step, (h0, h0), jnp.transpose(xt, (1, 0, 2)))
    return jnp.squeeze(hs[-1])


if __name__ == "__main__":
    # Small shapes consistent with the module: seq=8, batch=2,
    # x features=3, time features=1 -> input_size=4, embedding_dim=32.
    B, T, Fx, Ft, H = 2, 8, 3, 1, 32
    D = Fx + Ft

    key = jax.random.PRNGKey(0)
    kx, kt, k1, k2, k3, k4 = jax.random.split(key, 6)

    x = jax.random.normal(kx, (B, T, Fx), dtype=jnp.float32)
    time = jax.random.normal(kt, (B, T, Ft), dtype=jnp.float32)

    # Deterministic parameter init (PyTorch default: U(-1/sqrt(H), 1/sqrt(H))).
    bound = 1.0 / jnp.sqrt(jnp.float32(H))
    w_ih = jax.random.uniform(k1, (4 * H, D), jnp.float32, -bound, bound)
    w_hh = jax.random.uniform(k2, (4 * H, H), jnp.float32, -bound, bound)
    b_ih = jax.random.uniform(k3, (4 * H,), jnp.float32, -bound, bound)
    b_hh = jax.random.uniform(k4, (4 * H,), jnp.float32, -bound, bound)
    params = (w_ih, w_hh, b_ih, b_hh)

    out = rnn_forward_jit(x, time, params)
    out = jax.block_until_ready(out)

    ref = _reference_lstm(x, time, params)
    assert out.shape == (B, H), out.shape
    assert jnp.allclose(out, ref, atol=1e-5, rtol=1e-5), (
        float(jnp.max(jnp.abs(out - ref))))

    print("KERNEL_OK")
</pallas_src>

<mosaic_0001>
module attributes {stable_mosaic.version = 11 : i64} {
  func.func @_lstm_kernel(%arg0: memref<2x8x3xf32, #tpu.memory_space<vmem>>, %arg1: memref<2x8x1xf32, #tpu.memory_space<vmem>>, %arg2: memref<3x128xf32, #tpu.memory_space<vmem>>, %arg3: memref<1x128xf32, #tpu.memory_space<vmem>>, %arg4: memref<1x128xf32, #tpu.memory_space<vmem>>, %arg5: memref<32x128xf32, #tpu.memory_space<vmem>>, %arg6: memref<2x32xf32, #tpu.memory_space<vmem>>) attributes {dimension_semantics = [], scalar_prefetch = 0 : i64, scratch_operands = 0 : i64, tpu.core_type = #tpu.core_type<tc>} {
    %c0 = arith.constant 0 : index
    %c0_0 = arith.constant 0 : index
    %c0_1 = arith.constant 0 : index
    %0 = vector.load %arg0[%c0, %c0_0, %c0_1] : memref<2x8x3xf32, #tpu.memory_space<vmem>>, vector<2x8x3xf32>
    %1 = vector.shape_cast %0 : vector<2x8x3xf32> to vector<16x3xf32>
    %c0_2 = arith.constant 0 : index
    %c0_3 = arith.constant 0 : index
    %c0_4 = arith.constant 0 : index
    %2 = vector.load %arg1[%c0_2, %c0_3, %c0_4] : memref<2x8x1xf32, #tpu.memory_space<vmem>>, vector<2x8x1xf32>
    %3 = vector.shape_cast %2 : vector<2x8x1xf32> to vector<16x1xf32>
    %c0_5 = arith.constant 0 : index
    %c0_6 = arith.constant 0 : index
    %4 = vector.load %arg2[%c0_5, %c0_6] : memref<3x128xf32, #tpu.memory_space<vmem>>, vector<3x128xf32>
    %cst = arith.constant dense<0.000000e+00> : vector<16x128xf32>
    %5 = tpu.matmul %1, %4, %cst {dimension_numbers = #tpu.dot_dimension_numbers<[1], [0], [0], [1], [0, 0, 1, 1], [], []>} : vector<16x3xf32>, vector<3x128xf32>, vector<16x128xf32> -> vector<16x128xf32>
    %c0_7 = arith.constant 0 : index
    %c0_8 = arith.constant 0 : index
    %6 = vector.load %arg3[%c0_7, %c0_8] : memref<1x128xf32, #tpu.memory_space<vmem>>, vector<1x128xf32>
    %cst_9 = arith.constant dense<0.000000e+00> : vector<16x128xf32>
    %7 = tpu.matmul %3, %6, %cst_9 {dimension_numbers = #tpu.dot_dimension_numbers<[1], [0], [0], [1], [0, 0, 1, 1], [], []>} : vector<16x1xf32>, vector<1x128xf32>, vector<16x128xf32> -> vector<16x128xf32>
    %8 = arith.addf %5, %7 : vector<16x128xf32>
    %c0_10 = arith.constant 0 : index
    %c0_11 = arith.constant 0 : index
    %9 = vector.load %arg4[%c0_10, %c0_11] : memref<1x128xf32, #tpu.memory_space<vmem>>, vector<1x128xf32>
    %10 = vector.broadcast %9 : vector<1x128xf32> to vector<16x128xf32>
    %11 = arith.addf %8, %10 : vector<16x128xf32>
    %12 = vector.shape_cast %11 : vector<16x128xf32> to vector<2x8x128xf32>
    %c0_12 = arith.constant 0 : index
    %c0_13 = arith.constant 0 : index
    %13 = vector.load %arg5[%c0_12, %c0_13] : memref<32x128xf32, #tpu.memory_space<vmem>>, vector<32x128xf32>
    %14 = vector.extract_strided_slice %12 {offsets = [0, 0, 0], sizes = [2, 1, 128], strides = [1, 1, 1]} : vector<2x8x128xf32> to vector<2x1x128xf32>
    %15 = vector.shape_cast %14 : vector<2x1x128xf32> to vector<2x128xf32>
    %cst_14 = arith.constant 0.000000e+00 : f32
    %16 = vector.broadcast %cst_14 : f32 to vector<2x32xf32>
    %cst_15 = arith.constant 5.000000e-01 : f32
    %17 = vector.broadcast %cst_15 : f32 to vector<2x128xf32>
    %18 = arith.mulf %17, %15 : vector<2x128xf32>
    %19 = math.tanh %18 : vector<2x128xf32>
    %cst_16 = arith.constant 5.000000e-01 : f32
    %20 = vector.broadcast %cst_16 : f32 to vector<2x128xf32>
    %21 = arith.mulf %20, %19 : vector<2x128xf32>
    %cst_17 = arith.constant 5.000000e-01 : f32
    %22 = vector.broadcast %cst_17 : f32 to vector<2x128xf32>
    %23 = arith.addf %21, %22 : vector<2x128xf32>
    %24 = math.tanh %15 : vector<2x128xf32>
    %25 = vector.extract_strided_slice %23 {offsets = [0, 0], sizes = [2, 32], strides = [1, 1]} : vector<2x128xf32> to vector<2x32xf32>
    %26 = vector.extract_strided_slice %23 {offsets = [0, 32], sizes = [2, 32], strides = [1, 1]} : vector<2x128xf32> to vector<2x32xf32>
    %27 = vector.extract_strided_slice %24 {offsets = [0, 64], sizes = [2, 32], strides = [1, 1]} : vector<2x128xf32> to vector<2x32xf32>
    %28 = vector.extract_strided_slice %23 {offsets = [0, 96], sizes = [2, 32], strides = [1, 1]} : vector<2x128xf32> to vector<2x32xf32>
    %29 = arith.mulf %26, %16 : vector<2x32xf32>
    %30 = arith.mulf %25, %27 : vector<2x32xf32>
    %31 = arith.addf %29, %30 : vector<2x32xf32>
    %32 = math.tanh %31 : vector<2x32xf32>
    %33 = arith.mulf %28, %32 : vector<2x32xf32>
    %34 = vector.extract_strided_slice %12 {offsets = [0, 1, 0], sizes = [2, 1, 128], strides = [1, 1, 1]} : vector<2x8x128xf32> to vector<2x1x128xf32>
    %35 = vector.shape_cast %34 : vector<2x1x128xf32> to vector<2x128xf32>
    %cst_18 = arith.constant dense<0.000000e+00> : vector<2x128xf32>
    %36 = tpu.matmul %33, %13, %cst_18 {dimension_numbers = #tpu.dot_dimension_numbers<[1], [0], [0], [1], [0, 0, 1, 1], [], []>} : vector<2x32xf32>, vector<32x128xf32>, vector<2x128xf32> -> vector<2x128xf32>
    %37 = arith.addf %35, %36 : vector<2x128xf32>
    %cst_19 = arith.constant 5.000000e-01 : f32
    %38 = vector.broadcast %cst_19 : f32 to vector<2x128xf32>
    %39 = arith.mulf %38, %37 : vector<2x128xf32>
    %40 = math.tanh %39 : vector<2x128xf32>
    %cst_20 = arith.constant 5.000000e-01 : f32
    %41 = vector.broadcast %cst_20 : f32 to vector<2x128xf32>
    %42 = arith.mulf %41, %40 : vector<2x128xf32>
    %cst_21 = arith.constant 5.000000e-01 : f32
    %43 = vector.broadcast %cst_21 : f32 to vector<2x128xf32>
    %44 = arith.addf %42, %43 : vector<2x128xf32>
    %45 = math.tanh %37 : vector<2x128xf32>
    %46 = vector.extract_strided_slice %44 {offsets = [0, 0], sizes = [2, 32], strides = [1, 1]} : vector<2x128xf32> to vector<2x32xf32>
    %47 = vector.extract_strided_slice %44 {offsets = [0, 32], sizes = [2, 32], strides = [1, 1]} : vector<2x128xf32> to vector<2x32xf32>
    %48 = vector.extract_strided_slice %45 {offsets = [0, 64], sizes = [2, 32], strides = [1, 1]} : vector<2x128xf32> to vector<2x32xf32>
    %49 = vector.extract_strided_slice %44 {offsets = [0, 96], sizes = [2, 32], strides = [1, 1]} : vector<2x128xf32> to vector<2x32xf32>
    %50 = arith.mulf %47, %31 : vector<2x32xf32>
    %51 = arith.mulf %46, %48 : vector<2x32xf32>
    %52 = arith.addf %50, %51 : vector<2x32xf32>
    %53 = math.tanh %52 : vector<2x32xf32>
    %54 = arith.mulf %49, %53 : vector<2x32xf32>
    %55 = vector.extract_strided_slice %12 {offsets = [0, 2, 0], sizes = [2, 1, 128], strides = [1, 1, 1]} : vector<2x8x128xf32> to vector<2x1x128xf32>
    %56 = vector.shape_cast %55 : vector<2x1x128xf32> to vector<2x128xf32>
    %cst_22 = arith.constant dense<0.000000e+00> : vector<2x128xf32>
    %57 = tpu.matmul %54, %13, %cst_22 {dimension_numbers = #tpu.dot_dimension_numbers<[1], [0], [0], [1], [0, 0, 1, 1], [], []>} : vector<2x32xf32>, vector<32x128xf32>, vector<2x128xf32> -> vector<2x128xf32>
    %58 = arith.addf %56, %57 : vector<2x128xf32>
    %cst_23 = arith.constant 5.000000e-01 : f32
    %59 = vector.broadcast %cst_23 : f32 to vector<2x128xf32>
    %60 = arith.mulf %59, %58 : vector<2x128xf32>
    %61 = math.tanh %60 : vector<2x128xf32>
    %cst_24 = arith.constant 5.000000e-01 : f32
    %62 = vector.broadcast %cst_24 : f32 to vector<2x128xf32>
    %63 = arith.mulf %62, %61 : vector<2x128xf32>
    %cst_25 = arith.constant 5.000000e-01 : f32
    %64 = vector.broadcast %cst_25 : f32 to vector<2x128xf32>
    %65 = arith.addf %63, %64 : vector<2x128xf32>
    %66 = math.tanh %58 : vector<2x128xf32>
    %67 = vector.extract_strided_slice %65 {offsets = [0, 0], sizes = [2, 32], strides = [1, 1]} : vector<2x128xf32> to vector<2x32xf32>
    %68 = vector.extract_strided_slice %65 {offsets = [0, 32], sizes = [2, 32], strides = [1, 1]} : vector<2x128xf32> to vector<2x32xf32>
    %69 = vector.extract_strided_slice %66 {offsets = [0, 64], sizes = [2, 32], strides = [1, 1]} : vector<2x128xf32> to vector<2x32xf32>
    %70 = vector.extract_strided_slice %65 {offsets = [0, 96], sizes = [2, 32], strides = [1, 1]} : vector<2x128xf32> to vector<2x32xf32>
    %71 = arith.mulf %68, %52 : vector<2x32xf32>
    %72 = arith.mulf %67, %69 : vector<2x32xf32>
    %73 = arith.addf %71, %72 : vector<2x32xf32>
    %74 = math.tanh %73 : vector<2x32xf32>
    %75 = arith.mulf %70, %74 : vector<2x32xf32>
    %76 = vector.extract_strided_slice %12 {offsets = [0, 3, 0], sizes = [2, 1, 128], strides = [1, 1, 1]} : vector<2x8x128xf32> to vector<2x1x128xf32>
    %77 = vector.shape_cast %76 : vector<2x1x128xf32> to vector<2x128xf32>
    %cst_26 = arith.constant dense<0.000000e+00> : vector<2x128xf32>
    %78 = tpu.matmul %75, %13, %cst_26 {dimension_numbers = #tpu.dot_dimension_numbers<[1], [0], [0], [1], [0, 0, 1, 1], [], []>} : vector<2x32xf32>, vector<32x128xf32>, vector<2x128xf32> -> vector<2x128xf32>
    %79 = arith.addf %77, %78 : vector<2x128xf32>
    %cst_27 = arith.constant 5.000000e-01 : f32
    %80 = vector.broadcast %cst_27 : f32 to vector<2x128xf32>
    %81 = arith.mulf %80, %79 : vector<2x128xf32>
    %82 = math.tanh %81 : vector<2x128xf32>
    %cst_28 = arith.constant 5.000000e-01 : f32
    %83 = vector.broadcast %cst_28 : f32 to vector<2x128xf32>
    %84 = arith.mulf %83, %82 : vector<2x128xf32>
    %cst_29 = arith.constant 5.000000e-01 : f32
    %85 = vector.broadcast %cst_29 : f32 to vector<2x128xf32>
    %86 = arith.addf %84, %85 : vector<2x128xf32>
    %87 = math.tanh %79 : vector<2x128xf32>
    %88 = vector.extract_strided_slice %86 {offsets = [0, 0], sizes = [2, 32], strides = [1, 1]} : vector<2x128xf32> to vector<2x32xf32>
    %89 = vector.extract_strided_slice %86 {offsets = [0, 32], sizes = [2, 32], strides = [1, 1]} : vector<2x128xf32> to vector<2x32xf32>
    %90 = vector.extract_strided_slice %87 {offsets = [0, 64], sizes = [2, 32], strides = [1, 1]} : vector<2x128xf32> to vector<2x32xf32>
    %91 = vector.extract_strided_slice %86 {offsets = [0, 96], sizes = [2, 32], strides = [1, 1]} : vector<2x128xf32> to vector<2x32xf32>
    %92 = arith.mulf %89, %73 : vector<2x32xf32>
    %93 = arith.mulf %88, %90 : vector<2x32xf32>
    %94 = arith.addf %92, %93 : vector<2x32xf32>
    %95 = math.tanh %94 : vector<2x32xf32>
    %96 = arith.mulf %91, %95 : vector<2x32xf32>
    %97 = vector.extract_strided_slice %12 {offsets = [0, 4, 0], sizes = [2, 1, 128], strides = [1, 1, 1]} : vector<2x8x128xf32> to vector<2x1x128xf32>
    %98 = vector.shape_cast %97 : vector<2x1x128xf32> to vector<2x128xf32>
    %cst_30 = arith.constant dense<0.000000e+00> : vector<2x128xf32>
    %99 = tpu.matmul %96, %13, %cst_30 {dimension_numbers = #tpu.dot_dimension_numbers<[1], [0], [0], [1], [0, 0, 1, 1], [], []>} : vector<2x32xf32>, vector<32x128xf32>, vector<2x128xf32> -> vector<2x128xf32>
    %100 = arith.addf %98, %99 : vector<2x128xf32>
    %cst_31 = arith.constant 5.000000e-01 : f32
    %101 = vector.broadcast %cst_31 : f32 to vector<2x128xf32>
    %102 = arith.mulf %101, %100 : vector<2x128xf32>
    %103 = math.tanh %102 : vector<2x128xf32>
    %cst_32 = arith.constant 5.000000e-01 : f32
    %104 = vector.broadcast %cst_32 : f32 to vector<2x128xf32>
    %105 = arith.mulf %104, %103 : vector<2x128xf32>
    %cst_33 = arith.constant 5.000000e-01 : f32
    %106 = vector.broadcast %cst_33 : f32 to vector<2x128xf32>
    %107 = arith.addf %105, %106 : vector<2x128xf32>
    %108 = math.tanh %100 : vector<2x128xf32>
    %109 = vector.extract_strided_slice %107 {offsets = [0, 0], sizes = [2, 32], strides = [1, 1]} : vector<2x128xf32> to vector<2x32xf32>
    %110 = vector.extract_strided_slice %107 {offsets = [0, 32], sizes = [2, 32], strides = [1, 1]} : vector<2x128xf32> to vector<2x32xf32>
    %111 = vector.extract_strided_slice %108 {offsets = [0, 64], sizes = [2, 32], strides = [1, 1]} : vector<2x128xf32> to vector<2x32xf32>
    %112 = vector.extract_strided_slice %107 {offsets = [0, 96], sizes = [2, 32], strides = [1, 1]} : vector<2x128xf32> to vector<2x32xf32>
    %113 = arith.mulf %110, %94 : vector<2x32xf32>
    %114 = arith.mulf %109, %111 : vector<2x32xf32>
    %115 = arith.addf %113, %114 : vector<2x32xf32>
    %116 = math.tanh %115 : vector<2x32xf32>
    %117 = arith.mulf %112, %116 : vector<2x32xf32>
    %118 = vector.extract_strided_slice %12 {offsets = [0, 5, 0], sizes = [2, 1, 128], strides = [1, 1, 1]} : vector<2x8x128xf32> to vector<2x1x128xf32>
    %119 = vector.shape_cast %118 : vector<2x1x128xf32> to vector<2x128xf32>
    %cst_34 = arith.constant dense<0.000000e+00> : vector<2x128xf32>
    %120 = tpu.matmul %117, %13, %cst_34 {dimension_numbers = #tpu.dot_dimension_numbers<[1], [0], [0], [1], [0, 0, 1, 1], [], []>} : vector<2x32xf32>, vector<32x128xf32>, vector<2x128xf32> -> vector<2x128xf32>
    %121 = arith.addf %119, %120 : vector<2x128xf32>
    %cst_35 = arith.constant 5.000000e-01 : f32
    %122 = vector.broadcast %cst_35 : f32 to vector<2x128xf32>
    %123 = arith.mulf %122, %121 : vector<2x128xf32>
    %124 = math.tanh %123 : vector<2x128xf32>
    %cst_36 = arith.constant 5.000000e-01 : f32
    %125 = vector.broadcast %cst_36 : f32 to vector<2x128xf32>
    %126 = arith.mulf %125, %124 : vector<2x128xf32>
    %cst_37 = arith.constant 5.000000e-01 : f32
    %127 = vector.broadcast %cst_37 : f32 to vector<2x128xf32>
    %128 = arith.addf %126, %127 : vector<2x128xf32>
    %129 = math.tanh %121 : vector<2x128xf32>
    %130 = vector.extract_strided_slice %128 {offsets = [0, 0], sizes = [2, 32], strides = [1, 1]} : vector<2x128xf32> to vector<2x32xf32>
    %131 = vector.extract_strided_slice %128 {offsets = [0, 32], sizes = [2, 32], strides = [1, 1]} : vector<2x128xf32> to vector<2x32xf32>
    %132 = vector.extract_strided_slice %129 {offsets = [0, 64], sizes = [2, 32], strides = [1, 1]} : vector<2x128xf32> to vector<2x32xf32>
    %133 = vector.extract_strided_slice %128 {offsets = [0, 96], sizes = [2, 32], strides = [1, 1]} : vector<2x128xf32> to vector<2x32xf32>
    %134 = arith.mulf %131, %115 : vector<2x32xf32>
    %135 = arith.mulf %130, %132 : vector<2x32xf32>
    %136 = arith.addf %134, %135 : vector<2x32xf32>
    %137 = math.tanh %136 : vector<2x32xf32>
    %138 = arith.mulf %133, %137 : vector<2x32xf32>
    %139 = vector.extract_strided_slice %12 {offsets = [0, 6, 0], sizes = [2, 1, 128], strides = [1, 1, 1]} : vector<2x8x128xf32> to vector<2x1x128xf32>
    %140 = vector.shape_cast %139 : vector<2x1x128xf32> to vector<2x128xf32>
    %cst_38 = arith.constant dense<0.000000e+00> : vector<2x128xf32>
    %141 = tpu.matmul %138, %13, %cst_38 {dimension_numbers = #tpu.dot_dimension_numbers<[1], [0], [0], [1], [0, 0, 1, 1], [], []>} : vector<2x32xf32>, vector<32x128xf32>, vector<2x128xf32> -> vector<2x128xf32>
    %142 = arith.addf %140, %141 : vector<2x128xf32>
    %cst_39 = arith.constant 5.000000e-01 : f32
    %143 = vector.broadcast %cst_39 : f32 to vector<2x128xf32>
    %144 = arith.mulf %143, %142 : vector<2x128xf32>
    %145 = math.tanh %144 : vector<2x128xf32>
    %cst_40 = arith.constant 5.000000e-01 : f32
    %146 = vector.broadcast %cst_40 : f32 to vector<2x128xf32>
    %147 = arith.mulf %146, %145 : vector<2x128xf32>
    %cst_41 = arith.constant 5.000000e-01 : f32
    %148 = vector.broadcast %cst_41 : f32 to vector<2x128xf32>
    %149 = arith.addf %147, %148 : vector<2x128xf32>
    %150 = math.tanh %142 : vector<2x128xf32>
    %151 = vector.extract_strided_slice %149 {offsets = [0, 0], sizes = [2, 32], strides = [1, 1]} : vector<2x128xf32> to vector<2x32xf32>
    %152 = vector.extract_strided_slice %149 {offsets = [0, 32], sizes = [2, 32], strides = [1, 1]} : vector<2x128xf32> to vector<2x32xf32>
    %153 = vector.extract_strided_slice %150 {offsets = [0, 64], sizes = [2, 32], strides = [1, 1]} : vector<2x128xf32> to vector<2x32xf32>
    %154 = vector.extract_strided_slice %149 {offsets = [0, 96], sizes = [2, 32], strides = [1, 1]} : vector<2x128xf32> to vector<2x32xf32>
    %155 = arith.mulf %152, %136 : vector<2x32xf32>
    %156 = arith.mulf %151, %153 : vector<2x32xf32>
    %157 = arith.addf %155, %156 : vector<2x32xf32>
    %158 = math.tanh %157 : vector<2x32xf32>
    %159 = arith.mulf %154, %158 : vector<2x32xf32>
    %160 = vector.extract_strided_slice %12 {offsets = [0, 7, 0], sizes = [2, 1, 128], strides = [1, 1, 1]} : vector<2x8x128xf32> to vector<2x1x128xf32>
    %161 = vector.shape_cast %160 : vector<2x1x128xf32> to vector<2x128xf32>
    %cst_42 = arith.constant dense<0.000000e+00> : vector<2x128xf32>
    %162 = tpu.matmul %159, %13, %cst_42 {dimension_numbers = #tpu.dot_dimension_numbers<[1], [0], [0], [1], [0, 0, 1, 1], [], []>} : vector<2x32xf32>, vector<32x128xf32>, vector<2x128xf32> -> vector<2x128xf32>
    %163 = arith.addf %161, %162 : vector<2x128xf32>
    %cst_43 = arith.constant 5.000000e-01 : f32
    %164 = vector.broadcast %cst_43 : f32 to vector<2x128xf32>
    %165 = arith.mulf %164, %163 : vector<2x128xf32>
    %166 = math.tanh %165 : vector<2x128xf32>
    %cst_44 = arith.constant 5.000000e-01 : f32
    %167 = vector.broadcast %cst_44 : f32 to vector<2x128xf32>
    %168 = arith.mulf %167, %166 : vector<2x128xf32>
    %cst_45 = arith.constant 5.000000e-01 : f32
    %169 = vector.broadcast %cst_45 : f32 to vector<2x128xf32>
    %170 = arith.addf %168, %169 : vector<2x128xf32>
    %171 = math.tanh %163 : vector<2x128xf32>
    %172 = vector.extract_strided_slice %170 {offsets = [0, 0], sizes = [2, 32], strides = [1, 1]} : vector<2x128xf32> to vector<2x32xf32>
    %173 = vector.extract_strided_slice %170 {offsets = [0, 32], sizes = [2, 32], strides = [1, 1]} : vector<2x128xf32> to vector<2x32xf32>
    %174 = vector.extract_strided_slice %171 {offsets = [0, 64], sizes = [2, 32], strides = [1, 1]} : vector<2x128xf32> to vector<2x32xf32>
    %175 = vector.extract_strided_slice %170 {offsets = [0, 96], sizes = [2, 32], strides = [1, 1]} : vector<2x128xf32> to vector<2x32xf32>
    %176 = arith.mulf %173, %157 : vector<2x32xf32>
    %177 = arith.mulf %172, %174 : vector<2x32xf32>
    %178 = arith.addf %176, %177 : vector<2x32xf32>
    %179 = math.tanh %178 : vector<2x32xf32>
    %180 = arith.mulf %175, %179 : vector<2x32xf32>
    %c0_46 = arith.constant 0 : index
    %c0_47 = arith.constant 0 : index
    %181 = vector.load %arg6[%c0_46, %c0_47] : memref<2x32xf32, #tpu.memory_space<vmem>>, vector<2x32xf32>
    tpu.vector_store %arg6[%c0_46, %c0_47], %180 {strides = array<i32>} : memref<2x32xf32, #tpu.memory_space<vmem>>, vector<2x32xf32>,
    return
  }
}

</mosaic_0001>

<bundles_post_ra>
// kernel: rnn_forward.1
= control target key start
LH: loop header
LB: loop body
LE: loop exit
PB: predicated region body
PF: predicated region fallthrough
CT: control target
= control target key end

     0   :  { %vm37_vm0 = vcmask 1040384   ;;  %vm30_vm1 = vcmask 7168   ;;  %vm123_vm2 = vcmask 1042432   ;;  %vm116_vm3 = vcmask 23552   ;;  %s1782_s0 = inlined_call_operand.vmem [shape: f32[2,8,3], index: 0, kind: input, shape index: {}]   ;;  %s1783_s1 = inlined_call_operand.vmem [shape: f32[2,8,1], index: 1, kind: input, shape index: {}]   ;;  %s1784_s2 = inlined_call_operand.vmem [shape: f32[3,128], index: 2, kind: input, shape index: {}]   ;;  %s1785_s3 = inlined_call_operand.vmem [shape: f32[1,128], index: 3, kind: input, shape index: {}]   ;;  %s1786_s4 = inlined_call_operand.vmem [shape: f32[1,128], index: 4, kind: input, shape index: {}]   ;;  %s1787_s5 = inlined_call_operand.vmem [shape: f32[32,128], index: 5, kind: input, shape index: {}]   ;;  %s1788_s6 = inlined_call_operand.hbm [shape: f32[2,32], index: 6, kind: output, shape index: {}]  }
   0x1   :  { %v29_v0 = vld [vmem:[%s1785_s3] sm:$0x1]  ;;  %v27_v2 = vld [vmem:[%s1783_s1 + $0x8] sm:$0xff] }
   0x2   :  { %v26_v1 = vld [vmem:[%s1783_s1] sm:$0xff]  ;;  %1292 = vmatprep.subr.msk.mxu0 %vm37_vm0, %v29_v0 }
   0x3   :  { %1294 = vmatprep.mubr.msk.f32.mxu0 %vm30_vm1, %v26_v1  ;;  %v28_v3 = vld [vmem:[%s1784_s2] sm:$0x7]  ;;  %1293 = vmatpush3.msk.msra.mxu0 %vm37_vm0, %v29_v0 }
   0x4   :  { %v24_v4 = vld [vmem:[%s1782_s0] sm:$0xff] }
   0x5   :  { %11 = vsyncpa [#allocation3], 0  ;;  %1295 = vmatmul.mubr.msk.f32.vlgmr.msra.gmra.mrb[0].mxu0 %vm30_vm1, %v27_v2  ;;  %1297 = vmatprep.subr.msk.mxu0 %vm123_vm2, %v28_v3  ;;  %v25_v5 = vld [vmem:[%s1782_s0 + $0x8] sm:$0xff]  ;;  %v1243_v6 = vld [vmem:[%s1786_s4] ss:$0 sm:$0xff]  ;;  %s1549_s2 = smov 64  }
   0x6   :  { %1298 = vmatpush3.msk.msra.mxu0 %vm123_vm2, %v28_v3  ;;  %1299 = vmatprep.mubr.msk.f32.mxu0 %vm116_vm3, %v24_v4  ;;  %s1550_s0 = smov 32   ;;  %v211_v31 = vld [vmem:[%s1787_s5] sm:$0xff]  ;;  %v212_v32 = vld [vmem:[%s1787_s5 + $0x8] sm:$0xff]  ;;  %v213_v33 = vld [vmem:[%s1787_s5 + $0x10] sm:$0xff]  ;;  %v1551_v34 = vmov 0.0|0.0   ;;  %vm1552_vm4 = vmmov 0  }
   0x7   :  { %1379 = vmatprep.subr.bf16.mxu1 %v1551_v34  ;;  %v1639_v35 = vpack.c.bf16 %v212_v32, %v211_v31  ;;  %v214_v36 = vld [vmem:[%s1787_s5 + $0x18] sm:$0xff]  ;;  %v1553_v37 = vmov 0.0   ;;  %1385 = vmatprep.subr.bf16.mxu0 %v1551_v34  ;;  %vm262_vm5 = vcmask 1041409   ;;  %vm266_vm6 = vcmask 261120   ;;  %s1554_s5 = smov [#allocation2]  }
   0x8   :  { %1310 = vmatprep.mubr.msk.f32.mxu1 %vm1552_vm4, %v1553_v37  ;;  %v1650_v38 = vpack.c.bf16 %v214_v36, %v213_v33  ;;  %vm1219_vm7 = vcmask 261127   ;;  %s1229_s16 = sshll.u32 %s1554_s5, 4  ;;  %vm1221_vm8 = vcmask 253952   ;;  %s1230_s16 = int_to_ptr.vmem [resolvable:$true] %s1229_s16 }
   0x9   :  { %1381 = vmatpush3.bf16.msra.mxu1 %v1639_v35  ;;  %s1525_s17 = scalar_lea.vmem %s1230_s16, 32  ;;  %p1530_p1 = scmp.lt.s32.totalorder %s1230_s16, %s1230_s16 }
   0xa   :  { %1382 = vmatprep.subr.bf16.mxu1 %v1551_v34  ;;  %p1526_p0 = scmp.ne.s32.totalorder %s1230_s16, %s1525_s17  ;;  %p1531_p2 = scmp.lt.s32.totalorder %s1525_s17, %s1525_s17 }
   0xc   :  { %p1532_p3 = por %p1531_p2, %p1530_p1 }
   0xd   :  { %1300 = vmatmul.mubr.msk.f32.vlgmr.msra.gmra.mrb[0].mxu0 %vm116_vm3, %v25_v5  ;;  %1384 = vmatpush3.bf16.msra.mxu1 %v1650_v38 }
   0xe   :  { %1321 = vmatprep.mubr.msk.f32.mxu0 %vm1552_vm4, %v1553_v37  ;;  %1387 = vmatpush3.bf16.msra.mxu0 %v1639_v35  ;;  %p1533_p4 = pnand %p1532_p3, %p1526_p0 }
   0xf   :  { %1388 = vmatprep.subr.bf16.mxu0 %v1551_v34  ;;  %1391 = vmatprep.subr.bf16.mxu1 %v1551_v34 }
  0x12   :  { %1390 = vmatpush3.bf16.msra.mxu0 %v1650_v38 }
  0x13   :  { %1397 = vmatprep.subr.bf16.mxu0 %v1551_v34 }
  0xe0   :  { %v1301_v7 = vpop.f32.mrb[0].mxu0 }
  0xe1   :  { %v1611_v8 = vadd.f32 %v1301_v7, %v1243_v6  ;;  %v193_v9 = vpop.f32.mrb[1].mxu0 }
  0xe2   :  { %v1613_v10 = vadd.f32 %v1243_v6, %v193_v9 }
  0xe3   :  { %1429 = vtanh.f32 %v1611_v8  ;;  %v216_v13 = vmul.f32 0.5, %v1611_v8 }
  0xe4   :  { %1431 = vtanh.f32 %v1613_v10  ;;  %v215_v14 = vmul.f32 0.5, %v1613_v10 }
  0xe5   :  { %1433 = vtanh.f32 %v216_v13 }
  0xe6   :  { %1435 = vtanh.f32 %v215_v14 }
  0xed   :  { %v1430_v11 = vpop.eup %1429 }
  0xee   :  { %231 = vrot.lane.b32.xlu0 %v1430_v11, %s1549_s2  ;;  %v1432_v12 = vpop.eup %1431 }
  0xef   :  { %v1434_v15 = vpop.eup %1433 }
  0xf0   :  { %v220_v16 = vmul.f32 0.5, %v1434_v15  ;;  %v1436_v17 = vpop.eup %1435 }
  0xf1   :  { %v219_v19 = vmul.f32 0.5, %v1436_v17 }
  0xf2   :  { %229 = vrot.lane.b32.xlu0 %v1432_v12, %s1549_s2  ;;  %v222_v18 = vadd.f32 0.5, %v220_v16 }
  0xf3   :  { %v221_v22 = vadd.f32 0.5, %v219_v19 }
  0xf4   :  { %v226_v25 = vmul.f32 0.0, %v222_v18 }
  0xf5   :  { %v225_v28 = vmul.f32 0.0, %v221_v22 }
 0x160   :  { %v232_v20 = vpop.permute.xlu0 %231 }
 0x161   :  { %v236_v21 = vmul.f32 %v232_v20, %v222_v18 }
 0x163   :  { %241 = vrot.lane.b32.xlu1 %v236_v21, %s1550_s0 }
 0x164   :  { %v230_v23 = vpop.permute.xlu0 %229 }
 0x165   :  { %v235_v24 = vmul.f32 %v230_v23, %v221_v22 }
 0x167   :  { %239 = vrot.lane.b32.xlu1 %v235_v24, %s1550_s0 }
 0x1d5   :  { %v242_v26 = vpop.permute.xlu1 %241 }
 0x1d6   :  { %v1623_v27 = vadd.f32 %v242_v26, %v226_v25 }
 0x1d8   :  { %1437 = vtanh.f32 %v1623_v27  ;;  %v358_v3 = vrot.slane %v1623_v27, 7 }
 0x1d9   :  { %v240_v29 = vpop.permute.xlu1 %239 }
 0x1da   :  { %v1626_v30 = vadd.f32 %v240_v29, %v225_v28 }
 0x1dc   :  { %1439 = vtanh.f32 %v1626_v30  ;;  %v357_v5 = vrot.slane %v1626_v30, 7 }
 0x1e2   :  { %v1438_v39 = vpop.eup %1437 }
 0x1e3   :  { %253 = vrot.lane.b32.xlu0 %v1438_v39, %s1549_s2 }
 0x1e6   :  { %v1440_v40 = vpop.eup %1439 }
 0x1e7   :  { %251 = vrot.lane.b32.xlu1 %v1440_v40, %s1549_s2 }
 0x255   :  { %v254_v41 = vpop.permute.xlu0 %253 }
 0x256   :  { %v258_v42 = vmul.f32 %v254_v41, %v222_v18 }
 0x258   :  { %v261_v44 = vrot.slane %v258_v42, 7 }
 0x259   :  { %v252_v43 = vpop.permute.xlu1 %251 }
 0x25a   :  { %v257_v45 = vmul.f32 %v252_v43, %v221_v22 }
 0x25c   :  { %v263_v46 = vsel %vm262_vm5, %v261_v44, %v257_v45 }
 0x25d   :  { %264 = vrot.lane.b32.xlu0 %v263_v46, %s1550_s0 }
 0x2cf   :  { %v265_v47 = vpop.permute.xlu0 %264 }
 0x2d0   :  { %1311 = vmatmul.mubr.msk.f32.vlgmr.msra.gmra.mrb[0].mxu1 %vm266_vm6, %v265_v47 }
 0x2d1   :  { %1393 = vmatpush3.bf16.msra.mxu1 %v1639_v35  ;;  %1332 = vmatprep.mubr.msk.f32.mxu1 %vm1552_vm4, %v1553_v37 }
 0x2d2   :  { %1394 = vmatprep.subr.bf16.mxu1 %v1551_v34 }
 0x2d5   :  { %1396 = vmatpush3.bf16.msra.mxu1 %v1650_v38 }
 0x2d6   :  { %1403 = vmatprep.subr.bf16.mxu1 %v1551_v34 }
 0x3a3   :  { %v335_v48 = vpop.f32.mrb[0].mxu1 }
 0x3a4   :  { %v340_v49 = vrot.slane %v335_v48, 7  ;;  %v344_v50 = vadd.f32 %v335_v48, %v1611_v8  ;;  %v1312_v51 = vpop.f32.mrb[1].mxu1 }
 0x3a6   :  { %v343_v52 = vadd.f32 %v340_v49, %v1613_v10  ;;  %1441 = vtanh.f32 %v344_v50  ;;  %v346_v55 = vmul.f32 0.5, %v344_v50 }
 0x3a8   :  { %1443 = vtanh.f32 %v343_v52  ;;  %v345_v56 = vmul.f32 0.5, %v343_v52 }
 0x3a9   :  { %1445 = vtanh.f32 %v346_v55 }
 0x3aa   :  { %1447 = vtanh.f32 %v345_v56 }
 0x3b0   :  { %v1442_v53 = vpop.eup %1441 }
 0x3b1   :  { %367 = vrot.lane.b32.xlu0 %v1442_v53, %s1549_s2 }
 0x3b2   :  { %v1444_v54 = vpop.eup %1443 }
 0x3b3   :  { %365 = vrot.lane.b32.xlu1 %v1444_v54, %s1549_s2  ;;  %v1446_v57 = vpop.eup %1445 }
 0x3b4   :  { %v1448_v58 = vpop.eup %1447  ;;  %v350_v59 = vmul.f32 0.5, %v1446_v57 }
 0x3b5   :  { %v349_v60 = vmul.f32 0.5, %v1448_v58 }
 0x3b6   :  { %v352_v61 = vadd.f32 0.5, %v350_v59 }
 0x3b7   :  { %v351_v0 = vadd.f32 0.5, %v349_v60 }
 0x3b8   :  { %v362_v4 = vmul.f32 %v358_v3, %v352_v61 }
 0x3b9   :  { %v361_v9 = vmul.f32 %v357_v5, %v351_v0 }
 0x423   :  { %v368_v62 = vpop.permute.xlu0 %367 }
 0x424   :  { %v372_v63 = vmul.f32 %v368_v62, %v352_v61 }
 0x425   :  { %v366_v1 = vpop.permute.xlu1 %365 }
 0x426   :  { %377 = vrot.lane.b32.xlu0 %v372_v63, %s1550_s0  ;;  %v371_v2 = vmul.f32 %v366_v1, %v351_v0 }
 0x428   :  { %375 = vrot.lane.b32.xlu1 %v371_v2, %s1550_s0 }
 0x498   :  { %v378_v6 = vpop.permute.xlu0 %377 }
 0x499   :  { %v382_v7 = vadd.f32 %v378_v6, %v362_v4 }
 0x49a   :  { %v376_v11 = vpop.permute.xlu1 %375 }
 0x49b   :  { %1449 = vtanh.f32 %v382_v7  ;;  %v381_v12 = vadd.f32 %v376_v11, %v361_v9  ;;  %v493_v47 = vrot.slane %v382_v7, 7 }
 0x49d   :  { %1451 = vtanh.f32 %v381_v12  ;;  %v492_v46 = vrot.slane %v381_v12, 7 }
 0x4a5   :  { %v1450_v13 = vpop.eup %1449 }
 0x4a6   :  { %389 = vrot.lane.b32.xlu0 %v1450_v13, %s1549_s2 }
 0x4a7   :  { %v1452_v14 = vpop.eup %1451 }
 0x4a8   :  { %387 = vrot.lane.b32.xlu1 %v1452_v14, %s1549_s2 }
 0x518   :  { %v390_v15 = vpop.permute.xlu0 %389 }
 0x519   :  { %v394_v18 = vmul.f32 %v390_v15, %v352_v61 }
 0x51a   :  { %v388_v16 = vpop.permute.xlu1 %387 }
 0x51b   :  { %v393_v17 = vmul.f32 %v388_v16, %v351_v0 }
 0x51d   :  { %v397_v19 = vrot.slane %v393_v17, 1 }
 0x51f   :  { %v398_v20 = vsel %vm262_vm5, %v394_v18, %v397_v19 }
 0x520   :  { %399 = vrot.lane.b32.xlu1 %v398_v20, %s1550_s0 }
 0x592   :  { %v400_v21 = vpop.permute.xlu1 %399 }
 0x593   :  { %1322 = vmatmul.mubr.msk.f32.vlgmr.msra.gmra.mrb[2].mxu0 %vm266_vm6, %v400_v21 }
 0x594   :  { %1399 = vmatpush3.bf16.msra.mxu0 %v1639_v35  ;;  %1343 = vmatprep.mubr.msk.f32.mxu0 %vm1552_vm4, %v1553_v37 }
 0x595   :  { %1400 = vmatprep.subr.bf16.mxu0 %v1551_v34 }
 0x598   :  { %1402 = vmatpush3.bf16.msra.mxu0 %v1650_v38 }
 0x599   :  { %1409 = vmatprep.subr.bf16.mxu0 %v1551_v34 }
 0x666   :  { %v469_v22 = vpop.f32.mrb[2].mxu0 }
 0x667   :  { %v474_v23 = vrot.slane %v469_v22, 6  ;;  %v475_v24 = vrot.slane %v469_v22, 7  ;;  %v1323_v25 = vpop.f32.mrb[3].mxu0 }
 0x669   :  { %v478_v26 = vadd.f32 %v474_v23, %v1613_v10  ;;  %v479_v27 = vadd.f32 %v475_v24, %v1611_v8 }
 0x66b   :  { %1453 = vtanh.f32 %v478_v26  ;;  %v480_v30 = vmul.f32 0.5, %v478_v26  ;;  %v481_v31 = vmul.f32 0.5, %v479_v27 }
 0x66c   :  { %1455 = vtanh.f32 %v479_v27 }
 0x66d   :  { %1457 = vtanh.f32 %v480_v30 }
 0x66e   :  { %1459 = vtanh.f32 %v481_v31 }
 0x675   :  { %v1454_v28 = vpop.eup %1453 }
 0x676   :  { %v1456_v29 = vpop.eup %1455  ;;  %500 = vrot.lane.b32.xlu0 %v1454_v28, %s1549_s2 }
 0x677   :  { %502 = vrot.lane.b32.xlu1 %v1456_v29, %s1549_s2  ;;  %v1458_v32 = vpop.eup %1457 }
 0x678   :  { %v1460_v33 = vpop.eup %1459  ;;  %v484_v36 = vmul.f32 0.5, %v1458_v32 }
 0x679   :  { %v485_v39 = vmul.f32 0.5, %v1460_v33 }
 0x67a   :  { %v486_v40 = vadd.f32 0.5, %v484_v36 }
 0x67b   :  { %v487_v41 = vadd.f32 0.5, %v485_v39 }
 0x67c   :  { %v496_v48 = vmul.f32 %v492_v46, %v486_v40 }
 0x67d   :  { %v497_v49 = vmul.f32 %v493_v47, %v487_v41 }
 0x6e8   :  { %v501_v42 = vpop.permute.xlu0 %500 }
 0x6e9   :  { %v503_v43 = vpop.permute.xlu1 %502  ;;  %v506_v44 = vmul.f32 %v501_v42, %v486_v40 }
 0x6ea   :  { %v507_v45 = vmul.f32 %v503_v43, %v487_v41 }
 0x6eb   :  { %510 = vrot.lane.b32.xlu0 %v506_v44, %s1550_s0 }
 0x6ec   :  { %512 = vrot.lane.b32.xlu1 %v507_v45, %s1550_s0 }
 0x75d   :  { %v511_v50 = vpop.permute.xlu0 %510 }
 0x75e   :  { %v513_v51 = vpop.permute.xlu1 %512  ;;  %v516_v52 = vadd.f32 %v511_v50, %v496_v48 }
 0x75f   :  { %v517_v53 = vadd.f32 %v513_v51, %v497_v49 }
 0x760   :  { %1461 = vtanh.f32 %v516_v52  ;;  %v628_v22 = vrot.slane %v516_v52, 7 }
 0x761   :  { %1463 = vtanh.f32 %v517_v53  ;;  %v629_v23 = vrot.slane %v517_v53, 7 }
 0x76a   :  { %v1462_v54 = vpop.eup %1461 }
 0x76b   :  { %v1464_v55 = vpop.eup %1463  ;;  %522 = vrot.lane.b32.xlu0 %v1462_v54, %s1549_s2 }
 0x76c   :  { %524 = vrot.lane.b32.xlu1 %v1464_v55, %s1549_s2 }
 0x7dd   :  { %v523_v56 = vpop.permute.xlu0 %522 }
 0x7de   :  { %v525_v57 = vpop.permute.xlu1 %524  ;;  %v528_v58 = vmul.f32 %v523_v56, %v486_v40 }
 0x7df   :  { %v529_v59 = vmul.f32 %v525_v57, %v487_v41 }
 0x7e0   :  { %v532_v60 = vrot.slane %v528_v58, 2 }
 0x7e1   :  { %v533_v61 = vrot.slane %v529_v59, 1 }
 0x7e3   :  { %v534_v62 = vsel %vm262_vm5, %v533_v61, %v532_v60 }
 0x7e4   :  { %535 = vrot.lane.b32.xlu0 %v534_v62, %s1550_s0 }
 0x856   :  { %v536_v63 = vpop.permute.xlu0 %535 }
 0x857   :  { %1333 = vmatmul.mubr.msk.f32.vlgmr.msra.gmra.mrb[2].mxu1 %vm266_vm6, %v536_v63 }
 0x858   :  { %1405 = vmatpush3.bf16.msra.mxu1 %v1639_v35  ;;  %1354 = vmatprep.mubr.msk.f32.mxu1 %vm1552_vm4, %v1553_v37 }
 0x859   :  { %1406 = vmatprep.subr.bf16.mxu1 %v1551_v34 }
 0x85c   :  { %1408 = vmatpush3.bf16.msra.mxu1 %v1650_v38 }
 0x85d   :  { %1415 = vmatprep.subr.bf16.mxu1 %v1551_v34 }
 0x92a   :  { %v605_v0 = vpop.f32.mrb[2].mxu1 }
 0x92b   :  { %v610_v1 = vrot.slane %v605_v0, 5  ;;  %v611_v2 = vrot.slane %v605_v0, 6  ;;  %v1334_v3 = vpop.f32.mrb[3].mxu1 }
 0x92d   :  { %v614_v4 = vadd.f32 %v610_v1, %v1613_v10  ;;  %v615_v5 = vadd.f32 %v611_v2, %v1611_v8 }
 0x92f   :  { %1465 = vtanh.f32 %v614_v4  ;;  %v616_v9 = vmul.f32 0.5, %v614_v4  ;;  %v617_v11 = vmul.f32 0.5, %v615_v5 }
 0x930   :  { %1467 = vtanh.f32 %v615_v5 }
 0x931   :  { %1469 = vtanh.f32 %v616_v9 }
 0x932   :  { %1471 = vtanh.f32 %v617_v11 }
 0x939   :  { %v1466_v6 = vpop.eup %1465 }
 0x93a   :  { %v1468_v7 = vpop.eup %1467  ;;  %636 = vrot.lane.b32.xlu1 %v1466_v6, %s1549_s2 }
 0x93b   :  { %638 = vrot.lane.b32.xlu0 %v1468_v7, %s1549_s2  ;;  %v1470_v12 = vpop.eup %1469 }
 0x93c   :  { %v1472_v13 = vpop.eup %1471  ;;  %v620_v14 = vmul.f32 0.5, %v1470_v12 }
 0x93d   :  { %v621_v15 = vmul.f32 0.5, %v1472_v13 }
 0x93e   :  { %v622_v16 = vadd.f32 0.5, %v620_v14 }
 0x93f   :  { %v623_v17 = vadd.f32 0.5, %v621_v15 }
 0x940   :  { %v632_v24 = vmul.f32 %v628_v22, %v622_v16 }
 0x941   :  { %v633_v25 = vmul.f32 %v629_v23, %v623_v17 }
 0x9ac   :  { %v637_v18 = vpop.permute.xlu1 %636 }
 0x9ad   :  { %v639_v19 = vpop.permute.xlu0 %638  ;;  %v642_v20 = vmul.f32 %v637_v18, %v622_v16 }
 0x9ae   :  { %v643_v21 = vmul.f32 %v639_v19, %v623_v17 }
 0x9af   :  { %646 = vrot.lane.b32.xlu1 %v642_v20, %s1550_s0 }
 0x9b0   :  { %648 = vrot.lane.b32.xlu0 %v643_v21, %s1550_s0 }
 0xa21   :  { %v647_v26 = vpop.permute.xlu1 %646 }
 0xa22   :  { %v649_v27 = vpop.permute.xlu0 %648  ;;  %v652_v28 = vadd.f32 %v647_v26, %v632_v24 }
 0xa23   :  { %v653_v29 = vadd.f32 %v649_v27, %v633_v25 }
 0xa24   :  { %1473 = vtanh.f32 %v652_v28  ;;  %v764_v0 = vrot.slane %v652_v28, 7 }
 0xa25   :  { %1475 = vtanh.f32 %v653_v29  ;;  %v765_v1 = vrot.slane %v653_v29, 7 }
 0xa2e   :  { %v1474_v30 = vpop.eup %1473 }
 0xa2f   :  { %v1476_v31 = vpop.eup %1475  ;;  %658 = vrot.lane.b32.xlu1 %v1474_v30, %s1549_s2 }
 0xa30   :  { %660 = vrot.lane.b32.xlu0 %v1476_v31, %s1549_s2 }
 0xaa1   :  { %v659_v32 = vpop.permute.xlu1 %658 }
 0xaa2   :  { %v661_v33 = vpop.permute.xlu0 %660  ;;  %v664_v36 = vmul.f32 %v659_v32, %v622_v16 }
 0xaa3   :  { %v665_v39 = vmul.f32 %v661_v33, %v623_v17 }
 0xaa4   :  { %v668_v40 = vrot.slane %v664_v36, 3 }
 0xaa5   :  { %v669_v41 = vrot.slane %v665_v39, 2 }
 0xaa7   :  { %v670_v42 = vsel %vm262_vm5, %v669_v41, %v668_v40 }
 0xaa8   :  { %671 = vrot.lane.b32.xlu1 %v670_v42, %s1550_s0 }
 0xb1a   :  { %v672_v43 = vpop.permute.xlu1 %671 }
 0xb1b   :  { %1344 = vmatmul.mubr.msk.f32.vlgmr.msra.gmra.mrb[4].mxu0 %vm266_vm6, %v672_v43 }
 0xb1c   :  { %1411 = vmatpush3.bf16.msra.mxu0 %v1639_v35  ;;  %1365 = vmatprep.mubr.msk.f32.mxu0 %vm1552_vm4, %v1553_v37 }
 0xb1d   :  { %1412 = vmatprep.subr.bf16.mxu0 %v1551_v34 }
 0xb20   :  { %1414 = vmatpush3.bf16.msra.mxu0 %v1650_v38 }
 0xbee   :  { %v741_v44 = vpop.f32.mrb[4].mxu0 }
 0xbef   :  { %v746_v45 = vrot.slane %v741_v44, 4  ;;  %v747_v46 = vrot.slane %v741_v44, 5  ;;  %v1345_v47 = vpop.f32.mrb[5].mxu0 }
 0xbf1   :  { %v750_v48 = vadd.f32 %v746_v45, %v1613_v10  ;;  %v751_v49 = vadd.f32 %v747_v46, %v1611_v8 }
 0xbf3   :  { %1477 = vtanh.f32 %v750_v48  ;;  %v752_v52 = vmul.f32 0.5, %v750_v48  ;;  %v753_v53 = vmul.f32 0.5, %v751_v49 }
 0xbf4   :  { %1479 = vtanh.f32 %v751_v49 }
 0xbf5   :  { %1481 = vtanh.f32 %v752_v52 }
 0xbf6   :  { %1483 = vtanh.f32 %v753_v53 }
 0xbfd   :  { %v1478_v50 = vpop.eup %1477 }
 0xbfe   :  { %v1480_v51 = vpop.eup %1479  ;;  %772 = vrot.lane.b32.xlu0 %v1478_v50, %s1549_s2 }
 0xbff   :  { %774 = vrot.lane.b32.xlu1 %v1480_v51, %s1549_s2  ;;  %v1482_v54 = vpop.eup %1481 }
 0xc00   :  { %v1484_v55 = vpop.eup %1483  ;;  %v756_v56 = vmul.f32 0.5, %v1482_v54 }
 0xc01   :  { %v757_v57 = vmul.f32 0.5, %v1484_v55 }
 0xc02   :  { %v758_v58 = vadd.f32 0.5, %v756_v56 }
 0xc03   :  { %v759_v59 = vadd.f32 0.5, %v757_v57 }
 0xc04   :  { %v768_v2 = vmul.f32 %v764_v0, %v758_v58 }
 0xc05   :  { %v769_v3 = vmul.f32 %v765_v1, %v759_v59 }
 0xc70   :  { %v773_v60 = vpop.permute.xlu0 %772 }
 0xc71   :  { %v775_v61 = vpop.permute.xlu1 %774  ;;  %v778_v62 = vmul.f32 %v773_v60, %v758_v58 }
 0xc72   :  { %v779_v63 = vmul.f32 %v775_v61, %v759_v59 }
 0xc73   :  { %782 = vrot.lane.b32.xlu0 %v778_v62, %s1550_s0 }
 0xc74   :  { %784 = vrot.lane.b32.xlu1 %v779_v63, %s1550_s0 }
 0xce5   :  { %v783_v4 = vpop.permute.xlu0 %782 }
 0xce6   :  { %v785_v5 = vpop.permute.xlu1 %784  ;;  %v788_v6 = vadd.f32 %v783_v4, %v768_v2 }
 0xce7   :  { %v789_v7 = vadd.f32 %v785_v5, %v769_v3 }
 0xce8   :  { %1485 = vtanh.f32 %v788_v6  ;;  %v900_v40 = vrot.slane %v788_v6, 7 }
 0xce9   :  { %1487 = vtanh.f32 %v789_v7  ;;  %v901_v41 = vrot.slane %v789_v7, 7 }
 0xcf2   :  { %v1486_v9 = vpop.eup %1485 }
 0xcf3   :  { %v1488_v11 = vpop.eup %1487  ;;  %794 = vrot.lane.b32.xlu0 %v1486_v9, %s1549_s2 }
 0xcf4   :  { %796 = vrot.lane.b32.xlu1 %v1488_v11, %s1549_s2 }
 0xd65   :  { %v795_v12 = vpop.permute.xlu0 %794 }
 0xd66   :  { %v797_v13 = vpop.permute.xlu1 %796  ;;  %v800_v14 = vmul.f32 %v795_v12, %v758_v58 }
 0xd67   :  { %v801_v15 = vmul.f32 %v797_v13, %v759_v59 }
 0xd68   :  { %v804_v16 = vrot.slane %v800_v14, 4 }
 0xd69   :  { %v805_v17 = vrot.slane %v801_v15, 3 }
 0xd6b   :  { %v806_v18 = vsel %vm262_vm5, %v805_v17, %v804_v16 }
 0xd6c   :  { %807 = vrot.lane.b32.xlu0 %v806_v18, %s1550_s0 }
 0xdde   :  { %v808_v19 = vpop.permute.xlu0 %807 }
 0xddf   :  { %1355 = vmatmul.mubr.msk.f32.vlgmr.msra.gmra.mrb[4].mxu1 %vm266_vm6, %v808_v19 }
 0xde0   :  { %1417 = vmatpush3.bf16.msra.mxu1 %v1639_v35  ;;  %1376 = vmatprep.mubr.msk.f32.mxu1 %vm1552_vm4, %v1553_v37 }
 0xde1   :  { %1418 = vmatprep.subr.bf16.mxu1 %v1551_v34 }
 0xde4   :  { %1420 = vmatpush3.bf16.msra.mxu1 %v1650_v38 }
 0xeb2   :  { %v877_v20 = vpop.f32.mrb[4].mxu1 }
 0xeb3   :  { %v882_v21 = vrot.slane %v877_v20, 3  ;;  %v883_v22 = vrot.slane %v877_v20, 4  ;;  %v1356_v23 = vpop.f32.mrb[5].mxu1 }
 0xeb5   :  { %v886_v24 = vadd.f32 %v882_v21, %v1613_v10  ;;  %v887_v25 = vadd.f32 %v883_v22, %v1611_v8 }
 0xeb7   :  { %1489 = vtanh.f32 %v886_v24  ;;  %v888_v35 = vmul.f32 0.5, %v886_v24  ;;  %v889_v34 = vmul.f32 0.5, %v887_v25 }
 0xeb8   :  { %1491 = vtanh.f32 %v887_v25 }
 0xeb9   :  { %1493 = vtanh.f32 %v888_v35 }
 0xeba   :  { %1495 = vtanh.f32 %v889_v34 }
 0xec1   :  { %v1490_v26 = vpop.eup %1489 }
 0xec2   :  { %v1492_v27 = vpop.eup %1491  ;;  %908 = vrot.lane.b32.xlu1 %v1490_v26, %s1549_s2 }
 0xec3   :  { %910 = vrot.lane.b32.xlu0 %v1492_v27, %s1549_s2  ;;  %v1494_v37 = vpop.eup %1493 }
 0xec4   :  { %v1496_v38 = vpop.eup %1495  ;;  %v892_v28 = vmul.f32 0.5, %v1494_v37 }
 0xec5   :  { %v893_v29 = vmul.f32 0.5, %v1496_v38 }
 0xec6   :  { %v894_v30 = vadd.f32 0.5, %v892_v28 }
 0xec7   :  { %v895_v31 = vadd.f32 0.5, %v893_v29 }
 0xec8   :  { %v904_v42 = vmul.f32 %v900_v40, %v894_v30 }
 0xec9   :  { %v905_v43 = vmul.f32 %v901_v41, %v895_v31 }
 0xf34   :  { %v909_v32 = vpop.permute.xlu1 %908 }
 0xf35   :  { %v911_v33 = vpop.permute.xlu0 %910  ;;  %v914_v36 = vmul.f32 %v909_v32, %v894_v30 }
 0xf36   :  { %v915_v39 = vmul.f32 %v911_v33, %v895_v31 }
 0xf37   :  { %918 = vrot.lane.b32.xlu1 %v914_v36, %s1550_s0 }
 0xf38   :  { %920 = vrot.lane.b32.xlu0 %v915_v39, %s1550_s0 }
 0xfa9   :  { %v919_v44 = vpop.permute.xlu1 %918 }
 0xfaa   :  { %v921_v45 = vpop.permute.xlu0 %920  ;;  %v924_v46 = vadd.f32 %v919_v44, %v904_v42 }
 0xfab   :  { %v925_v47 = vadd.f32 %v921_v45, %v905_v43 }
 0xfac   :  { %1497 = vtanh.f32 %v924_v46  ;;  %v1036_v16 = vrot.slane %v924_v46, 7 }
 0xfad   :  { %1499 = vtanh.f32 %v925_v47  ;;  %v1037_v17 = vrot.slane %v925_v47, 7 }
 0xfb6   :  { %v1498_v48 = vpop.eup %1497 }
 0xfb7   :  { %v1500_v49 = vpop.eup %1499  ;;  %930 = vrot.lane.b32.xlu1 %v1498_v48, %s1549_s2 }
 0xfb8   :  { %932 = vrot.lane.b32.xlu0 %v1500_v49, %s1549_s2 }
0x1029   :  { %v931_v50 = vpop.permute.xlu1 %930 }
0x102a   :  { %v933_v51 = vpop.permute.xlu0 %932  ;;  %v936_v52 = vmul.f32 %v931_v50, %v894_v30 }
0x102b   :  { %v937_v53 = vmul.f32 %v933_v51, %v895_v31 }
0x102c   :  { %v940_v54 = vrot.slane %v936_v52, 5 }
0x102d   :  { %v941_v55 = vrot.slane %v937_v53, 4 }
0x102f   :  { %v942_v56 = vsel %vm262_vm5, %v941_v55, %v940_v54 }
0x1030   :  { %943 = vrot.lane.b32.xlu1 %v942_v56, %s1550_s0 }
0x10a2   :  { %v944_v57 = vpop.permute.xlu1 %943 }
0x10a3   :  { %1366 = vmatmul.mubr.msk.f32.vlgmr.msra.gmra.mrb[6].mxu0 %vm266_vm6, %v944_v57 }
0x1176   :  { %v1013_v58 = vpop.f32.mrb[6].mxu0 }
0x1177   :  { %v1018_v59 = vrot.slane %v1013_v58, 2  ;;  %v1019_v60 = vrot.slane %v1013_v58, 3  ;;  %v1367_v61 = vpop.f32.mrb[7].mxu0 }
0x1179   :  { %v1022_v62 = vadd.f32 %v1018_v59, %v1613_v10  ;;  %v1023_v63 = vadd.f32 %v1019_v60, %v1611_v8 }
0x117b   :  { %1501 = vtanh.f32 %v1022_v62  ;;  %v1024_v2 = vmul.f32 0.5, %v1022_v62  ;;  %v1025_v3 = vmul.f32 0.5, %v1023_v63 }
0x117c   :  { %1503 = vtanh.f32 %v1023_v63 }
0x117d   :  { %1505 = vtanh.f32 %v1024_v2 }
0x117e   :  { %1507 = vtanh.f32 %v1025_v3 }
0x1185   :  { %v1502_v0 = vpop.eup %1501 }
0x1186   :  { %v1504_v1 = vpop.eup %1503  ;;  %1044 = vrot.lane.b32.xlu0 %v1502_v0, %s1549_s2 }
0x1187   :  { %1046 = vrot.lane.b32.xlu1 %v1504_v1, %s1549_s2  ;;  %v1506_v4 = vpop.eup %1505 }
0x1188   :  { %v1508_v5 = vpop.eup %1507  ;;  %v1028_v6 = vmul.f32 0.5, %v1506_v4 }
0x1189   :  { %v1029_v7 = vmul.f32 0.5, %v1508_v5 }
0x118a   :  { %v1030_v9 = vadd.f32 0.5, %v1028_v6 }
0x118b   :  { %v1031_v11 = vadd.f32 0.5, %v1029_v7 }
0x118c   :  { %v1040_v18 = vmul.f32 %v1036_v16, %v1030_v9 }
0x118d   :  { %v1041_v19 = vmul.f32 %v1037_v17, %v1031_v11 }
0x11f8   :  { %v1045_v12 = vpop.permute.xlu0 %1044 }
0x11f9   :  { %v1047_v13 = vpop.permute.xlu1 %1046  ;;  %v1050_v14 = vmul.f32 %v1045_v12, %v1030_v9 }
0x11fa   :  { %v1051_v15 = vmul.f32 %v1047_v13, %v1031_v11 }
0x11fb   :  { %1054 = vrot.lane.b32.xlu0 %v1050_v14, %s1550_s0 }
0x11fc   :  { %1056 = vrot.lane.b32.xlu1 %v1051_v15, %s1550_s0 }
0x126d   :  { %v1055_v20 = vpop.permute.xlu0 %1054 }
0x126e   :  { %v1057_v21 = vpop.permute.xlu1 %1056  ;;  %v1060_v22 = vadd.f32 %v1055_v20, %v1040_v18 }
0x126f   :  { %v1061_v23 = vadd.f32 %v1057_v21, %v1041_v19 }
0x1270   :  { %1509 = vtanh.f32 %v1060_v22  ;;  %v1172_v52 = vrot.slane %v1060_v22, 7 }
0x1271   :  { %1511 = vtanh.f32 %v1061_v23  ;;  %v1173_v53 = vrot.slane %v1061_v23, 7 }
0x127a   :  { %v1510_v24 = vpop.eup %1509 }
0x127b   :  { %v1512_v25 = vpop.eup %1511  ;;  %1066 = vrot.lane.b32.xlu0 %v1510_v24, %s1549_s2 }
0x127c   :  { %1068 = vrot.lane.b32.xlu1 %v1512_v25, %s1549_s2 }
0x12ed   :  { %v1067_v26 = vpop.permute.xlu0 %1066 }
0x12ee   :  { %v1069_v27 = vpop.permute.xlu1 %1068  ;;  %v1072_v35 = vmul.f32 %v1067_v26, %v1030_v9 }
0x12ef   :  { %v1073_v34 = vmul.f32 %v1069_v27, %v1031_v11 }
0x12f0   :  { %v1076_v37 = vrot.slane %v1072_v35, 6 }
0x12f1   :  { %v1077_v38 = vrot.slane %v1073_v34, 5 }
0x12f3   :  { %v1078_v28 = vsel %vm262_vm5, %v1077_v38, %v1076_v37 }
0x12f4   :  { %1079 = vrot.lane.b32.xlu0 %v1078_v28, %s1550_s0 }
0x1366   :  { %v1080_v29 = vpop.permute.xlu0 %1079 }
0x1367   :  { %1377 = vmatmul.mubr.msk.f32.vlgmr.msra.gmra.mrb[6].mxu1 %vm266_vm6, %v1080_v29 }
0x143a   :  { %v1149_v30 = vpop.f32.mrb[6].mxu1 }
0x143b   :  { %v1154_v31 = vrot.slane %v1149_v30, 1  ;;  %v1155_v32 = vrot.slane %v1149_v30, 2  ;;  %v1378_v33 = vpop.f32.mrb[7].mxu1 }
0x143d   :  { %v1158_v36 = vadd.f32 %v1154_v31, %v1613_v10  ;;  %v1159_v39 = vadd.f32 %v1155_v32, %v1611_v8 }
0x143f   :  { %1513 = vtanh.f32 %v1158_v36  ;;  %v1160_v42 = vmul.f32 0.5, %v1158_v36  ;;  %v1161_v43 = vmul.f32 0.5, %v1159_v39 }
0x1440   :  { %1515 = vtanh.f32 %v1159_v39 }
0x1441   :  { %1517 = vtanh.f32 %v1160_v42 }
0x1442   :  { %1519 = vtanh.f32 %v1161_v43 }
0x1449   :  { %v1514_v40 = vpop.eup %1513 }
0x144a   :  { %v1516_v41 = vpop.eup %1515  ;;  %1180 = vrot.lane.b32.xlu0 %v1514_v40, %s1549_s2 }
0x144b   :  { %1182 = vrot.lane.b32.xlu1 %v1516_v41, %s1549_s2  ;;  %v1518_v44 = vpop.eup %1517 }
0x144c   :  { %v1520_v45 = vpop.eup %1519  ;;  %v1164_v46 = vmul.f32 0.5, %v1518_v44 }
0x144d   :  { %v1165_v47 = vmul.f32 0.5, %v1520_v45 }
0x144e   :  { %v1166_v48 = vadd.f32 0.5, %v1164_v46 }
0x144f   :  { %v1167_v10 = vadd.f32 0.5, %v1165_v47 }
0x1450   :  { %v1176_v54 = vmul.f32 %v1172_v52, %v1166_v48 }
0x1451   :  { %v1177_v55 = vmul.f32 %v1173_v53, %v1167_v10 }
0x14bc   :  { %v1181_v49 = vpop.permute.xlu0 %1180 }
0x14bd   :  { %v1183_v8 = vpop.permute.xlu1 %1182  ;;  %v1186_v50 = vmul.f32 %v1181_v49, %v1166_v48 }
0x14be   :  { %v1187_v51 = vmul.f32 %v1183_v8, %v1167_v10 }
0x14bf   :  { %1190 = vrot.lane.b32.xlu0 %v1186_v50, %s1550_s0 }
0x14c0   :  { %1192 = vrot.lane.b32.xlu1 %v1187_v51, %s1550_s0 }
0x1531   :  { %v1191_v56 = vpop.permute.xlu0 %1190 }
0x1532   :  { %v1193_v57 = vpop.permute.xlu1 %1192  ;;  %v1196_v58 = vadd.f32 %v1191_v56, %v1176_v54 }
0x1533   :  { %v1197_v59 = vadd.f32 %v1193_v57, %v1177_v55 }
0x1534   :  { %1521 = vtanh.f32 %v1196_v58 }
0x1535   :  { %1523 = vtanh.f32 %v1197_v59 }
0x153e   :  { %v1522_v60 = vpop.eup %1521 }
0x153f   :  { %v1524_v61 = vpop.eup %1523  ;;  %1202 = vrot.lane.b32.xlu0 %v1522_v60, %s1549_s2 }
0x1540   :  { %1204 = vrot.lane.b32.xlu1 %v1524_v61, %s1549_s2 }
0x15b1   :  { %v1203_v62 = vpop.permute.xlu0 %1202 }
0x15b2   :  { %v1205_v63 = vpop.permute.xlu1 %1204  ;;  %v1208_v0 = vmul.f32 %v1203_v62, %v1166_v48 }
0x15b3   :  { %v1209_v1 = vmul.f32 %v1205_v63, %v1167_v10 }
0x15b4   :  { %1213 = vrot.lane.b32.xlu1 %v1208_v0, %s1550_s0 }
0x15b5   :  { %v1212_v2 = vrot.slane %v1209_v1, 7 }
0x15b7   :  { %1215 = vrot.lane.b32.xlu0 %v1212_v2, %s1550_s0 }
0x1626   :  { %v1214_v3 = vpop.permute.xlu1 %1213 }
0x1627   :  { %1220 = vst.msk [vmem:[#allocation2 - $0x7] sm:$0x80] %vm1219_vm7, %v1214_v3 }
0x1629   :  { %v1216_v4 = vpop.permute.xlu0 %1215 }
0x162a   :  { %1222 = vst.msk [vmem:[#allocation2 + $0x1] sm:$0x1] %vm1221_vm8, %v1216_v4 }
0x162b   :  { %1536 = shalt.err (!%p1533_p4)
}
0x162c   :  { %s1537_s20 = scalar_lea.hbm %s1788_s6, 32 }
0x162d   :  { %p1538_p5 = scmp.ne.s32.totalorder %s1788_s6, %s1537_s20  ;;  %p1541_p6 = scmp.lt.u32.totalorder %s1537_s20, %s1788_s6 }
0x162f   :  { %p1543_p7 = pnand %p1541_p6, %p1538_p5 }
0x1631   :  { %1546 = shalt.err (!%p1543_p7)
}
0x1632   :  { %1232 = dma.vmem_to_hbm [thread:$0]  %s1230_s16, 32, %s1788_s6, [#allocation3]  }
0x1633   :  { %1547 = dma.done.wait [#allocation3], 32  }
0x1634   :  { %1548 = vsyncadd [#allocation3], 4294967264 }
0x1635   :  { %1236 = vsyncpa [#allocation3], 1 }

</bundles_post_ra>
